<compile_context>
chip_gen: v7x
topology: tpu7x:2x2x1
jax: 0.10.0
libtpu: 0.0.40
codegen_flags: <defaults>
</compile_context>

<pallas_src>
import functools

import jax
import jax.numpy as jnp
from jax.experimental import pallas as pl
from jax.experimental.pallas import tpu as pltpu


def _cdiv(a, b):
    return -(-a // b)


def _round_up(x, m):
    return ((x + m - 1) // m) * m


def _vmem_capacity_bytes():
    try:
        return int(pltpu.get_tpu_info().vmem_capacity_bytes)
    except Exception:
        return 64 * 1024 * 1024          # conservative (v7x-sized) fallback


def _contrastive_kernel(x1_ref, x2_ref, y_ref, out_ref, acc_ref, *,
                        margin, distance, b, d):
    i = pl.program_id(0)                 # batch-tile index ("parallel")
    k = pl.program_id(1)                 # feature-chunk index ("arbitrary", reduction)
    nk = pl.num_programs(1)
    tb, tk = x1_ref.shape

    @pl.when(k == 0)
    def _():
        acc_ref[...] = jnp.zeros_like(acc_ref)

    x1 = x1_ref[...].astype(jnp.float32)                 # (tb, tk)
    x2 = x2_ref[...].astype(jnp.float32)

    # Mask feature columns that overhang d (only possible when d is tiled and d % tk != 0).
    mask_cols = (d % tk) != 0
    if mask_cols:
        col = k * tk + jax.lax.broadcasted_iota(jnp.int32, (tb, tk), 1)
        col_ok = col < d

    def row_sum(m):                                       # (tb, tk) -> (1, tb) lane-dense
        if mask_cols:
            m = jnp.where(col_ok, m, 0.0)                 # select: garbage/NaN never enters
        return jnp.sum(m, axis=-1)[None, :]

    if distance == "cosine":
        acc_ref[0:1, :] += row_sum(x1 * x2)               # dot
        acc_ref[1:2, :] += row_sum(x1 * x1)               # |x1|^2
        acc_ref[2:3, :] += row_sum(x2 * x2)               # |x2|^2
    else:
        diff = x1 - x2 + 1e-6                             # pairwise_distance eps
        acc_ref[0:1, :] += row_sum(diff * diff)

    @pl.when(k == nk - 1)
    def _():
        if distance == "cosine":
            dot = acc_ref[0:1, :]
            s1 = acc_ref[1:2, :]
            s2 = acc_ref[2:3, :]
            # torch: dot / sqrt(clamp(s1*s2, eps^2)) == dot * rsqrt(max(s1*s2, 1e-16))  (EUP)
            cos = dot * jax.lax.rsqrt(jnp.maximum(s1 * s2, 1e-16))
            dist = 1.0 - cos
            dist_sq = dist * dist
        else:
            dist_sq = acc_ref[0:1, :]
            dist = jnp.sqrt(dist_sq)

        y = y_ref[0].astype(jnp.float32)                  # (1, tb)
        clamped = jnp.maximum(margin - dist, 0.0)
        loss = y * dist_sq + (1.0 - y) * (clamped * clamped)

        # Zero rows that overhang the real batch (select, so garbage/NaN never propagates).
        row = i * tb + jax.lax.broadcasted_iota(jnp.int32, (1, tb), 1)
        out_ref[0] = jnp.where(row < b, loss, 0.0)


def contrastive_loss(x1, x2, y, *, margin=1.0, distance="cosine", reduction="mean",
                     input_budget_bytes=None):
    """Pallas TPU implementation of ContrastiveLoss.forward.

    x1, x2: (b, d) arrays (any float dtype; upcast to f32 inside the kernel)
    y:      (b,)   labels (1 = similar pair, 0 = dissimilar)
    Returns a scalar for reduction in ('mean', 'sum'), else shape (b,).
    `input_budget_bytes` is a test/tuning knob for the per-tile input VMEM budget.
    """
    if distance not in ("cosine", "euclidean"):
        raise Exception("invalid distance")

    b, d = x1.shape
    itemsize = jnp.dtype(x1.dtype).itemsize
    sub = max(8, 32 // itemsize)              # sublane packing: 8 f32, 16 bf16, 32 int8

    vmem_cap = _vmem_capacity_bytes()
    input_budget = ((vmem_cap * 3) // 8 if input_budget_bytes is None
                    else int(input_budget_bytes))        # 24 MiB @64 MiB, 48 MiB @128 MiB
    vmem_limit = max(32 * 1024 * 1024,
                     min((vmem_cap * 3) // 4, 100 * 1024 * 1024))
    max_rows = 4096 if vmem_cap >= 96 * 1024 * 1024 else 2048

    b_r = _round_up(b, sub)

    # ---- tile planning: 2 inputs x 2 pipeline buffers of (tb, tk) must fit the budget -----
    cap = (input_budget // max(1, 4 * d * itemsize)) // sub * sub
    if cap >= sub:
        tk = d                                            # whole feature row per tile
        cap = min(cap, max_rows)
        num_tiles = _cdiv(b_r, cap)
        if b > sub:                                       # enough rows for >= 2 tiles
            num_tiles = max(num_tiles, 2)                 # keep both v7x TensorCores busy
            if num_tiles % 2:
                num_tiles += 1
        tb = _round_up(_cdiv(b_r, num_tiles), sub)
        num_tiles = _cdiv(b_r, tb)                        # last tile overhangs, never fully OOB
    else:
        # Very wide rows: minimal row tile and tile the feature dim ("arbitrary" axis).
        tb = sub
        num_tiles = _cdiv(b_r, tb)
        tk = (input_budget // max(1, 4 * tb * itemsize)) // 128 * 128
        tk = max(128, min(tk, _round_up(d, 128)))
    num_k = _cdiv(d, tk)

    # y (tiny) is the only thing we pad/reshape host-side: lane-dense (num_tiles, 1, tb).
    b_pad = num_tiles * tb
    y_lane = jnp.pad(y.astype(jnp.float32).reshape(-1),
                     (0, b_pad - b)).reshape(num_tiles, 1, tb)

    n_acc = 3 if distance == "cosine" else 1
    kernel = functools.partial(_contrastive_kernel, margin=float(margin),
                               distance=distance, b=b, d=d)

    flops_per = 6 if distance == "cosine" else 4
    cost = pl.CostEstimate(flops=flops_per * b * d, transcendentals=b,
                           bytes_accessed=2 * b * d * itemsize + 8 * b_pad)

    out = pl.pallas_call(
        kernel,
        out_shape=jax.ShapeDtypeStruct((num_tiles, 1, tb), jnp.float32),
        grid=(num_tiles, num_k),
        in_specs=[
            pl.BlockSpec((tb, tk), lambda i, k: (i, k)),
            pl.BlockSpec((tb, tk), lambda i, k: (i, k)),
            pl.BlockSpec((1, 1, tb), lambda i, k: (i, 0, 0)),
        ],
        out_specs=pl.BlockSpec((1, 1, tb), lambda i, k: (i, 0, 0)),
        scratch_shapes=[pltpu.VMEM((n_acc, tb), jnp.float32)],
        compiler_params=pltpu.CompilerParams(
            dimension_semantics=("parallel", "arbitrary"),
            vmem_limit_bytes=int(vmem_limit),
        ),
        cost_estimate=cost,
    )(x1, x2, y_lane)

    loss = out.reshape(-1)[:b]
    if reduction == "mean":
        return loss.mean()                # divide by the GLOBAL batch size
    if reduction == "sum":
        return loss.sum()
    return loss                           # 'none' -> per-sample loss, shape (b,)


def _reference(x1, x2, y, *, margin=1.0, distance="cosine", reduction="mean"):
    x1 = x1.astype(jnp.float32)
    x2 = x2.astype(jnp.float32)
    y = y.astype(jnp.float32)
    if distance == "cosine":
        dot = jnp.sum(x1 * x2, axis=-1)
        s1 = jnp.sum(x1 * x1, axis=-1)
        s2 = jnp.sum(x2 * x2, axis=-1)
        dist = 1.0 - dot / jnp.sqrt(jnp.maximum(s1 * s2, 1e-16))
    else:
        diff = x1 - x2 + 1e-6
        dist = jnp.sqrt(jnp.sum(diff * diff, axis=-1))
    loss = y * dist ** 2 + (1.0 - y) * jnp.clip(margin - dist, 0.0, None) ** 2
    if reduction == "mean":
        return loss.mean()
    if reduction == "sum":
        return loss.sum()
    return loss


if __name__ == "__main__":
    key = jax.random.PRNGKey(0)
    k1, k2, k3, k4, k5, k6, k7, k8, k9 = jax.random.split(key, 9)

    # Case 1: cosine / mean, b multiple of the sublane tile.
    b, d = 8, 32
    x1 = jax.random.normal(k1, (b, d), dtype=jnp.float32)
    x2 = jax.random.normal(k2, (b, d), dtype=jnp.float32)
    y = jax.random.bernoulli(k3, 0.5, (b,)).astype(jnp.float32)

    out = jax.block_until_ready(
        contrastive_loss(x1, x2, y, margin=1.0, distance="cosine", reduction="mean"))
    ref = _reference(x1, x2, y, margin=1.0, distance="cosine", reduction="mean")
    assert jnp.allclose(out, ref, rtol=1e-5, atol=1e-5), (out, ref)

    # Case 2: euclidean / sum.
    out = jax.block_until_ready(
        contrastive_loss(x1, x2, y, margin=1.0, distance="euclidean", reduction="sum"))
    ref = _reference(x1, x2, y, margin=1.0, distance="euclidean", reduction="sum")
    assert jnp.allclose(out, ref, rtol=1e-5, atol=1e-5), (out, ref)

    # Case 3: euclidean / none, b NOT a multiple of 8 (exercises row-overhang masking).
    b2 = 10
    x1b = jax.random.normal(k4, (b2, d), dtype=jnp.float32)
    x2b = jax.random.normal(k5, (b2, d), dtype=jnp.float32)
    yb = jax.random.bernoulli(k6, 0.5, (b2,)).astype(jnp.float32)

    out = jax.block_until_ready(
        contrastive_loss(x1b, x2b, yb, margin=1.0, distance="euclidean", reduction="none"))
    ref = _reference(x1b, x2b, yb, margin=1.0, distance="euclidean", reduction="none")
    assert out.shape == (b2,)
    assert jnp.allclose(out, ref, rtol=1e-5, atol=1e-5), (out, ref)

    # Case 4: bf16 inputs (exercises the 16-row sublane packing path; upcast in-kernel).
    x1h = x1b.astype(jnp.bfloat16)
    x2h = x2b.astype(jnp.bfloat16)
    out = jax.block_until_ready(
        contrastive_loss(x1h, x2h, yb, margin=1.0, distance="cosine", reduction="mean"))
    ref = _reference(x1h, x2h, yb, margin=1.0, distance="cosine", reduction="mean")
    assert jnp.allclose(out, ref, rtol=1e-4, atol=1e-5), (out, ref)

    # Case 5: tiny input budget forces the d-tiled fallback (grid (2, 3), tk=128,
    # overhanging feature columns + overhanging batch rows, multi-step accumulation).
    b3, d3 = 12, 300
    x1w = jax.random.normal(k7, (b3, d3), dtype=jnp.float32)
    x2w = jax.random.normal(k8, (b3, d3), dtype=jnp.float32)
    yw = jax.random.bernoulli(k9, 0.5, (b3,)).astype(jnp.float32)

    out = jax.block_until_ready(
        contrastive_loss(x1w, x2w, yw, margin=1.0, distance="cosine", reduction="mean",
                         input_budget_bytes=20000))
    ref = _reference(x1w, x2w, yw, margin=1.0, distance="cosine", reduction="mean")
    assert jnp.allclose(out, ref, rtol=1e-5, atol=1e-5), (out, ref)

    out = jax.block_until_ready(
        contrastive_loss(x1w, x2w, yw, margin=1.0, distance="euclidean", reduction="none",
                         input_budget_bytes=20000))
    ref = _reference(x1w, x2w, yw, margin=1.0, distance="euclidean", reduction="none")
    assert out.shape == (b3,)
    assert jnp.allclose(out, ref, rtol=1e-5, atol=1e-5), (out, ref)

    print("KERNEL_OK")
</pallas_src>

<mosaic_0001>
module attributes {stable_mosaic.version = 11 : i64} {
  func.func @_contrastive_kernel(%arg0: i32, %arg1: i32, %arg2: memref<8x32xf32, #tpu.memory_space<vmem>>, %arg3: memref<8x32xf32, #tpu.memory_space<vmem>>, %arg4: memref<1x1x8xf32, #tpu.memory_space<vmem>>, %arg5: memref<1x1x8xf32, #tpu.memory_space<vmem>>, %arg6: memref<3x8xf32, #tpu.memory_space<vmem>>) attributes {dimension_semantics = [#tpu.dimension_semantics<parallel>, #tpu.dimension_semantics<arbitrary>], iteration_bounds = array<i64: 1, 1>, scalar_prefetch = 0 : i64, scratch_operands = 1 : i64, tpu.core_type = #tpu.core_type<tc>, window_params = [{transform_indices = @transform_0, window_bounds = array<i64: 8, 32>}, {transform_indices = @transform_1, window_bounds = array<i64: 8, 32>}, {transform_indices = @transform_2, window_bounds = array<i64: 1, 1, 8>}, {transform_indices = @transform_3, window_bounds = array<i64: 1, 1, 8>}]} {
    %c0_i32 = arith.constant 0 : i32
    %0 = arith.cmpi eq, %arg1, %c0_i32 : i32
    %1 = arith.extui %0 : i1 to i32
    %c0_i32_0 = arith.constant 0 : i32
    %2 = arith.cmpi ne, %1, %c0_i32_0 : i32
    scf.if %2 {
      %cst_18 = arith.constant 0.000000e+00 : f32
      %26 = vector.broadcast %cst_18 : f32 to vector<3x8xf32>
      %c0_19 = arith.constant 0 : index
      %c0_20 = arith.constant 0 : index
      %27 = vector.load %arg6[%c0_19, %c0_20] : memref<3x8xf32, #tpu.memory_space<vmem>>, vector<3x8xf32>
      tpu.vector_store %arg6[%c0_19, %c0_20], %26 {strides = array<i32>} : memref<3x8xf32, #tpu.memory_space<vmem>>, vector<3x8xf32>,
    } else {
    }
    %c0 = arith.constant 0 : index
    %c0_1 = arith.constant 0 : index
    %3 = vector.load %arg2[%c0, %c0_1] : memref<8x32xf32, #tpu.memory_space<vmem>>, vector<8x32xf32>
    %c0_2 = arith.constant 0 : index
    %c0_3 = arith.constant 0 : index
    %4 = vector.load %arg3[%c0_2, %c0_3] : memref<8x32xf32, #tpu.memory_space<vmem>>, vector<8x32xf32>
    %c0_4 = arith.constant 0 : index
    %c0_5 = arith.constant 0 : index
    %5 = vector.load %arg6[%c0_4, %c0_5] : memref<3x8xf32, #tpu.memory_space<vmem>>, vector<1x8xf32>
    %6 = arith.mulf %3, %4 : vector<8x32xf32>
    %cst = arith.constant dense<0.000000e+00> : vector<8xf32>
    %7 = vector.multi_reduction <add>, %6, %cst [1] : vector<8x32xf32> to vector<8xf32>
    %8 = vector.shape_cast %7 : vector<8xf32> to vector<1x8xf32>
    %9 = arith.addf %5, %8 : vector<1x8xf32>
    %c0_6 = arith.constant 0 : index
    %c0_7 = arith.constant 0 : index
    %10 = vector.load %arg6[%c0_6, %c0_7] : memref<3x8xf32, #tpu.memory_space<vmem>>, vector<1x8xf32>
    tpu.vector_store %arg6[%c0_6, %c0_7], %9 {strides = array<i32>} : memref<3x8xf32, #tpu.memory_space<vmem>>, vector<1x8xf32>,
    %c1 = arith.constant 1 : index
    %c0_8 = arith.constant 0 : index
    %11 = vector.load %arg6[%c1, %c0_8] : memref<3x8xf32, #tpu.memory_space<vmem>>, vector<1x8xf32>
    %12 = arith.mulf %3, %3 : vector<8x32xf32>
    %cst_9 = arith.constant dense<0.000000e+00> : vector<8xf32>
    %13 = vector.multi_reduction <add>, %12, %cst_9 [1] : vector<8x32xf32> to vector<8xf32>
    %14 = vector.shape_cast %13 : vector<8xf32> to vector<1x8xf32>
    %15 = arith.addf %11, %14 : vector<1x8xf32>
    %c1_10 = arith.constant 1 : index
    %c0_11 = arith.constant 0 : index
    %16 = vector.load %arg6[%c1_10, %c0_11] : memref<3x8xf32, #tpu.memory_space<vmem>>, vector<1x8xf32>
    tpu.vector_store %arg6[%c1_10, %c0_11], %15 {strides = array<i32>} : memref<3x8xf32, #tpu.memory_space<vmem>>, vector<1x8xf32>,
    %c2 = arith.constant 2 : index
    %c0_12 = arith.constant 0 : index
    %17 = vector.load %arg6[%c2, %c0_12] : memref<3x8xf32, #tpu.memory_space<vmem>>, vector<1x8xf32>
    %18 = arith.mulf %4, %4 : vector<8x32xf32>
    %cst_13 = arith.constant dense<0.000000e+00> : vector<8xf32>
    %19 = vector.multi_reduction <add>, %18, %cst_13 [1] : vector<8x32xf32> to vector<8xf32>
    %20 = vector.shape_cast %19 : vector<8xf32> to vector<1x8xf32>
    %21 = arith.addf %17, %20 : vector<1x8xf32>
    %c2_14 = arith.constant 2 : index
    %c0_15 = arith.constant 0 : index
    %22 = vector.load %arg6[%c2_14, %c0_15] : memref<3x8xf32, #tpu.memory_space<vmem>>, vector<1x8xf32>
    tpu.vector_store %arg6[%c2_14, %c0_15], %21 {strides = array<i32>} : memref<3x8xf32, #tpu.memory_space<vmem>>, vector<1x8xf32>,
    %c0_i32_16 = arith.constant 0 : i32
    %23 = arith.cmpi eq, %arg1, %c0_i32_16 : i32
    %24 = arith.extui %23 : i1 to i32
    %c0_i32_17 = arith.constant 0 : i32
    %25 = arith.cmpi ne, %24, %c0_i32_17 : i32
    scf.if %25 {
      %c0_18 = arith.constant 0 : index
      %c0_19 = arith.constant 0 : index
      %26 = vector.load %arg6[%c0_18, %c0_19] : memref<3x8xf32, #tpu.memory_space<vmem>>, vector<1x8xf32>
      %c1_20 = arith.constant 1 : index
      %c0_21 = arith.constant 0 : index
      %27 = vector.load %arg6[%c1_20, %c0_21] : memref<3x8xf32, #tpu.memory_space<vmem>>, vector<1x8xf32>
      %c2_22 = arith.constant 2 : index
      %c0_23 = arith.constant 0 : index
      %28 = vector.load %arg6[%c2_22, %c0_23] : memref<3x8xf32, #tpu.memory_space<vmem>>, vector<1x8xf32>
      %29 = arith.mulf %27, %28 : vector<1x8xf32>
      %cst_24 = arith.constant 1.000000e-16 : f32
      %30 = vector.broadcast %cst_24 : f32 to vector<1x8xf32>
      %31 = arith.maximumf %29, %30 : vector<1x8xf32>
      %32 = math.rsqrt %31 : vector<1x8xf32>
      %33 = arith.mulf %26, %32 : vector<1x8xf32>
      %cst_25 = arith.constant 1.000000e+00 : f32
      %34 = vector.broadcast %cst_25 : f32 to vector<1x8xf32>
      %35 = arith.subf %34, %33 : vector<1x8xf32>
      %36 = arith.mulf %35, %35 : vector<1x8xf32>
      %c0_26 = arith.constant 0 : index
      %c0_27 = arith.constant 0 : index
      %c0_28 = arith.constant 0 : index
      %37 = vector.load %arg4[%c0_26, %c0_27, %c0_28] : memref<1x1x8xf32, #tpu.memory_space<vmem>>, vector<1x1x8xf32>
      %38 = vector.shape_cast %37 : vector<1x1x8xf32> to vector<1x8xf32>
      %cst_29 = arith.constant 1.000000e+00 : f32
      %39 = vector.broadcast %cst_29 : f32 to vector<1x8xf32>
      %40 = arith.subf %39, %35 : vector<1x8xf32>
      %cst_30 = arith.constant 0.000000e+00 : f32
      %41 = vector.broadcast %cst_30 : f32 to vector<1x8xf32>
      %42 = arith.maximumf %40, %41 : vector<1x8xf32>
      %43 = arith.mulf %38, %36 : vector<1x8xf32>
      %cst_31 = arith.constant 1.000000e+00 : f32
      %44 = vector.broadcast %cst_31 : f32 to vector<1x8xf32>
      %45 = arith.subf %44, %38 : vector<1x8xf32>
      %46 = arith.mulf %42, %42 : vector<1x8xf32>
      %47 = arith.mulf %45, %46 : vector<1x8xf32>
      %48 = arith.addf %43, %47 : vector<1x8xf32>
      %c8_i32 = arith.constant 8 : i32
      %49 = arith.muli %arg0, %c8_i32 : i32
      %50 = tpu.iota {dimensions = array<i32: 1>} : vector<1x8xi32>
      %51 = vector.broadcast %49 : i32 to vector<1x8xi32>
      %52 = arith.addi %51, %50 : vector<1x8xi32>
      %c8_i32_32 = arith.constant 8 : i32
      %53 = vector.broadcast %c8_i32_32 : i32 to vector<1x8xi32>
      %54 = arith.cmpi slt, %52, %53 : vector<1x8xi32>
      %cst_33 = arith.constant 0.000000e+00 : f32
      %55 = vector.broadcast %cst_33 : f32 to vector<1x8xf32>
      %56 = arith.select %54, %48, %55 : vector<1x8xi1>, vector<1x8xf32>
      %c0_34 = arith.constant 0 : index
      %c0_35 = arith.constant 0 : index
      %c0_36 = arith.constant 0 : index
      %57 = vector.load %arg5[%c0_34, %c0_35, %c0_36] : memref<1x1x8xf32, #tpu.memory_space<vmem>>, vector<1x1x8xf32>
      %58 = vector.shape_cast %57 : vector<1x1x8xf32> to vector<1x8xf32>
      %59 = vector.shape_cast %56 : vector<1x8xf32> to vector<1x1x8xf32>
      tpu.vector_store %arg5[%c0_34, %c0_35, %c0_36], %59 {strides = array<i32>} : memref<1x1x8xf32, #tpu.memory_space<vmem>>, vector<1x1x8xf32>,
    } else {
    }
    return
  }
  func.func @transform_0(%arg0: i32, %arg1: i32) -> (i32, i32) {
    %c0_i32 = arith.constant 0 : i32
    return %arg0, %arg1 : i32, i32
  }
  func.func @transform_1(%arg0: i32, %arg1: i32) -> (i32, i32) {
    %c0_i32 = arith.constant 0 : i32
    return %arg0, %arg1 : i32, i32
  }
  func.func @transform_2(%arg0: i32, %arg1: i32) -> (i32, i32, i32) {
    %c0_i32 = arith.constant 0 : i32
    %c0_i32_0 = arith.constant 0 : i32
    %c0_i32_1 = arith.constant 0 : i32
    return %arg0, %c0_i32, %c0_i32_0 : i32, i32, i32
  }
  func.func @transform_3(%arg0: i32, %arg1: i32) -> (i32, i32, i32) {
    %c0_i32 = arith.constant 0 : i32
    %c0_i32_0 = arith.constant 0 : i32
    %c0_i32_1 = arith.constant 0 : i32
    return %arg0, %c0_i32, %c0_i32_0 : i32, i32, i32
  }
}

</mosaic_0001>

<bundles_post_ra>
// kernel: tpu_custom_call.1
= control target key start
LH: loop header
LB: loop body
LE: loop exit
PB: predicated region body
PF: predicated region fallthrough
CT: control target
= control target key end

     0   :  { %8 = vsyncpa [#allocation4], 0  ;;  %s277_s0 = inlined_call_operand.hbm [shape: f32[8,32], index: 0, kind: input, shape index: {}]   ;;  %s278_s1 = inlined_call_operand.hbm [shape: f32[8,32], index: 1, kind: input, shape index: {}]   ;;  %s279_s2 = inlined_call_operand.vmem [shape: f32[1,1,8], index: 2, kind: input, shape index: {}]   ;;  %s280_s3 = inlined_call_operand.hbm [shape: f32[1,1,8], index: 3, kind: output, shape index: {}]  }
   0x1   :  { %9 = vsyncpa [#allocation7], 0 }
   0x2   :  { %10 = vsyncpa [#allocation5], 0  ;;  %s210_s12 = smov [#allocation3]   ;;  %s211_s14 = smov [#allocation6]  }
   0x3   :  { %s17_s13 = sshll.u32 %s210_s12, 4  ;;  %s27_s15 = sshll.u32 %s211_s14, 4  ;;  %s18_s13 = int_to_ptr.vmem [resolvable:$true] %s17_s13  ;;  %s28_s15 = int_to_ptr.vmem [resolvable:$true] %s27_s15 }
   0x4   :  { %s138_s18 = scalar_lea.hbm %s277_s0, 128 }
   0x5   :  { %p139_p0 = scmp.ne.s32.totalorder %s277_s0, %s138_s18  ;;  %p142_p1 = scmp.lt.u32.totalorder %s138_s18, %s277_s0 }
   0x7   :  { %p144_p2 = pnand %p142_p1, %p139_p0 }
   0x9   :  { %147 = shalt.err (!%p144_p2)
}
   0xa   :  { %s148_s23 = scalar_lea.vmem %s18_s13, 128  ;;  %p153_p4 = scmp.lt.s32.totalorder %s18_s13, %s18_s13 }
   0xb   :  { %p149_p3 = scmp.ne.s32.totalorder %s18_s13, %s148_s23  ;;  %p154_p5 = scmp.lt.s32.totalorder %s148_s23, %s148_s23 }
   0xd   :  { %p155_p6 = por %p154_p5, %p153_p4 }
   0xf   :  { %p156_p7 = pnand %p155_p6, %p149_p3 }
  0x11   :  { %159 = shalt.err (!%p156_p7)
}
  0x12   :  { %20 = dma.hbm_to_vmem [thread:$0]  %s277_s0, 128, %s18_s13, [#allocation4]  }
  0x13   :  { %s160_s28 = scalar_lea.hbm %s278_s1, 128 }
  0x14   :  { %p161_p8 = scmp.ne.s32.totalorder %s278_s1, %s160_s28  ;;  %p164_p9 = scmp.lt.u32.totalorder %s160_s28, %s278_s1 }
  0x16   :  { %p166_p10 = pnand %p164_p9, %p161_p8 }
  0x18   :  { %169 = shalt.err (!%p166_p10)
}
  0x19   :  { %s170_s6 = scalar_lea.vmem %s28_s15, 128  ;;  %p175_p12 = scmp.lt.s32.totalorder %s28_s15, %s28_s15 }
  0x1a   :  { %p171_p11 = scmp.ne.s32.totalorder %s28_s15, %s170_s6  ;;  %p176_p13 = scmp.lt.s32.totalorder %s170_s6, %s170_s6 }
  0x1c   :  { %p177_p0 = por %p176_p13, %p175_p12 }
  0x1e   :  { %p178_p1 = pnand %p177_p0, %p171_p11 }
  0x20   :  { %181 = shalt.err (!%p178_p1)
}
  0x21   :  { %30 = dma.hbm_to_vmem [thread:$0]  %s278_s1, 128, %s28_s15, [#allocation7]  }
  0x22   :  { %204 = dma.done.wait [#allocation4], 128  }
  0x23   :  { %205 = vsyncadd [#allocation4], 4294967168 }
  0x24   :  { %206 = dma.done.wait [#allocation7], 128  }
  0x25   :  { %207 = vsyncadd [#allocation7], 4294967168  ;;  %vm43_vm0 = vcmask 59392   ;;  %v212_v0 = vmov 0.0   ;;  %v45_v1 = vld [vmem:[#allocation3] sm:$0xff]  ;;  %vm49_vm1 = vcmask 261120   ;;  %v54_v9 = vlaneseq }
  0x26   :  { %44 = vst.msk [vmem:[#allocation2] sm:$0x7] %vm43_vm0, %v212_v0  ;;  %v46_v2 = vld [vmem:[#allocation6] sm:$0xff]  ;;  %v65_v3 = vmul.f32 %v45_v1, %v45_v1  ;;  %vm62_vm2 = vcmask 57344   ;;  %v102_v34 = vld [vmem:[%s279_s2] sm:$0x1] }
  0x27   :  { %v78_v4 = vmul.f32 %v46_v2, %v46_v2  ;;  %v48_v5 = vmul.f32 %v46_v2, %v45_v1  ;;  %v55_v10 = vand.u32 127, %v54_v9  ;;  %v57_v11 = vshrl.u32 %v54_v9, 7  ;;  %s213_s9 = smov [#allocation8]  }
  0x28   :  { %v66_v6 = vsel %vm49_vm1, %v65_v3, 0.0  ;;  %v106_v37 = vsub.f32 1.0, %v102_v34  ;;  %s122_s10 = sshll.u32 %s213_s9, 4  ;;  %s123_s10 = int_to_ptr.vmem [resolvable:$true] %s122_s10 }
  0x29   :  { %v50_v7 = vsel %vm49_vm1, %v48_v5, 0.0  ;;  %67 = vadd.xlane.f32.xlu0 %v66_v6  ;;  %v79_v8 = vsel %vm49_vm1, %v78_v4, 0.0  ;;  %v58_v12 = vsub.s32 %v55_v10, %v57_v11  ;;  %vm113_vm3 = vcmp.lt.s32.totalorder %v55_v10, 8  ;;  %s182_s11 = scalar_lea.vmem %s123_s10, 16  ;;  %s186_s12 = scalar_lea.vmem %s123_s10, 32 }
  0x2a   :  { %51 = vadd.xlane.f32.xlu1 %v50_v7  ;;  %p183_p2 = scmp.ne.s32.totalorder %s123_s10, %s182_s11  ;;  %p187_p3 = scmp.lt.s32.totalorder %s123_s10, %s123_s10 }
  0x2b   :  { %p188_p4 = scmp.lt.s32.totalorder %s186_s12, %s182_s11 }
  0x2d   :  { %80 = vadd.xlane.f32.xlu0 %v79_v8  ;;  %v64_v14 = vld [vmem:[#allocation2 + $0x1] sm:$0x1]  ;;  %v47_v16 = vld [vmem:[#allocation2] sm:$0x1]  ;;  %v77_v22 = vld [vmem:[#allocation2 + $0x2] sm:$0x1]  ;;  %p189_p5 = por %p188_p4, %p187_p3 }
  0x2f   :  { %p190_p6 = pnand %p189_p5, %p183_p2 }
  0xb6   :  { %v68_v13 = vpop.xlane.xlu0 %67 }
  0xb7   :  { %v52_v15 = vpop.xlane.xlu1 %51  ;;  %v73_v17 = vrot.slane %v68_v13, %v58_v12 }
  0xb8   :  { %v59_v18 = vrot.slane %v52_v15, %v58_v12 }
  0xb9   :  { %v75_v19 = vadd.f32 %v73_v17, %v64_v14 }
  0xba   :  { %v61_v20 = vadd.f32 %v59_v18, %v47_v16  ;;  %v81_v21 = vpop.xlane.xlu0 %80 }
  0xbb   :  { %v86_v23 = vrot.slane %v81_v21, %v58_v12  ;;  %76 = vst.msk [vmem:[#allocation2 + $0x1] sm:$0x1] %vm62_vm2, %v75_v19 }
  0xbc   :  { %63 = vst.msk [vmem:[#allocation2] sm:$0x1] %vm62_vm2, %v61_v20 }
  0xbd   :  { %v88_v24 = vadd.f32 %v86_v23, %v77_v22 }
  0xbf   :  { %89 = vst.msk [vmem:[#allocation2 + $0x2] sm:$0x1] %vm62_vm2, %v88_v24 }
  0xc2   :  { %v94_v25 = vld [vmem:[#allocation2 + $0x1] sm:$0x1] }
  0xc3   :  { %v93_v29 = vld [vmem:[#allocation2] sm:$0x1] }
  0xc6   :  { %v95_v26 = vld [vmem:[#allocation2 + $0x2] sm:$0x1] }
  0xc7   :  { %v96_v27 = vmul.f32 %v95_v26, %v94_v25 }
  0xc9   :  { %v97_v28 = vmax.f32 %v96_v27, 1e-16 }
  0xcb   :  { %136 = vrsqrt.f32 %v97_v28 }
  0xd5   :  { %v137_v30 = vpop.eup %136 }
  0xd6   :  { %v99_v31 = vmul.f32 %v137_v30, %v93_v29 }
  0xd8   :  { %v100_v32 = vsub.f32 1.0, %v99_v31 }
  0xda   :  { %v103_v33 = vsub.f32 1.0, %v100_v32  ;;  %v101_v35 = vmul.f32 %v100_v32, %v100_v32 }
  0xdc   :  { %v104_v36 = vmax.f32 %v103_v33, 0.0  ;;  %v105_v39 = vmul.f32 %v102_v34, %v101_v35 }
  0xde   :  { %v107_v38 = vmul.f32 %v104_v36, %v104_v36 }
  0xe0   :  { %v108_v40 = vmul.f32 %v107_v38, %v106_v37 }
  0xe2   :  { %v109_v41 = vadd.f32 %v108_v40, %v105_v39 }
  0xe4   :  { %v114_v42 = vsel %vm113_vm3, %v109_v41, 0.0 }
  0xe5   :  { %115 = vst.msk [vmem:[#allocation8] sm:$0x1] %vm62_vm2, %v114_v42 }
  0xe6   :  { %193 = shalt.err (!%p190_p6)
}
  0xe7   :  { %s194_s14 = scalar_lea.hbm %s280_s3, 16 }
  0xe8   :  { %p195_p7 = scmp.ne.s32.totalorder %s280_s3, %s194_s14  ;;  %p198_p8 = scmp.lt.u32.totalorder %s194_s14, %s280_s3 }
  0xea   :  { %p200_p9 = pnand %p198_p8, %p195_p7 }
  0xec   :  { %203 = shalt.err (!%p200_p9)
}
  0xed   :  { %125 = dma.vmem_to_hbm [thread:$0]  %s123_s10, 16, %s280_s3, [#allocation5]  }
  0xee   :  { %208 = dma.done.wait [#allocation5], 16  }
  0xef   :  { %209 = vsyncadd [#allocation5], 4294967280 }
  0xf0   :  { %129 = vsyncpa [#allocation4], 1 }
  0xf1   :  { %130 = vsyncpa [#allocation7], 1 }
  0xf2   :  { %131 = vsyncpa [#allocation5], 1 }

</bundles_post_ra>
